<compile_context>
chip_gen: v6e
topology: v6e:2x2x1
jax: 0.10.0
libtpu: 0.0.40
codegen_flags: <defaults>
</compile_context>

<pallas_src>
import jax
import jax.numpy as jnp
from jax.experimental import pallas as pl
from jax.experimental.pallas import tpu as pltpu


_LANES = 128
_MAX_BLOCK_ROWS = 1024          # 1024 * 128 * 4B = 512 KiB per operand tile


# ----------------------------------------------------------------------------
# Pallas kernel: fused elementwise Poisson proximal update
# ----------------------------------------------------------------------------
def _v_update_kernel(rho2_ref, v_ref, y_ref, a_ref, o_ref):
    # rho2_ref: SMEM scalar (1,)
    # v_ref / y_ref / a_ref / o_ref: (block_rows, 128) VMEM tiles
    rho2 = rho2_ref[0]                      # scalar
    half_inv_rho2 = 0.5 / rho2              # computed once per tile
    four_rho2 = 4.0 * rho2

    v = v_ref[...]
    y = y_ref[...]
    a = a_ref[...]

    t1 = rho2 * v - a                                   # VPU
    root = jnp.sqrt(t1 * t1 + four_rho2 * y)            # EUP sqrt + VPU fma
    o_ref[...] = half_inv_rho2 * (root - t1)            # VPU, unmasked store


# ----------------------------------------------------------------------------
# Wrapper: accepts PyTorch-style tensors (any matching shape), scalar rho2
# ----------------------------------------------------------------------------
@jax.jit
def v_update_poisson(v_tilde, y, rho2, alpha):
    orig_shape = v_tilde.shape
    dtype = jnp.float32

    v = v_tilde.astype(dtype)
    y = jnp.broadcast_to(y, orig_shape).astype(dtype)
    a = jnp.broadcast_to(alpha, orig_shape).astype(dtype)
    rho2_arr = jnp.asarray(rho2, dtype).reshape((1,))

    # Flatten everything into a lane-dense (rows, 128) slab.
    total = v.size
    rows = -(-total // _LANES)
    rows = ((rows + 7) // 8) * 8                          # sublane multiple of 8
    block_rows = min(rows, _MAX_BLOCK_ROWS)
    rows_padded = ((rows + block_rows - 1) // block_rows) * block_rows
    padded = rows_padded * _LANES

    def to2d(x):
        flat = x.reshape((-1,))
        flat = jnp.pad(flat, (0, padded - total))
        return flat.reshape((rows_padded, _LANES))

    v2, y2, a2 = to2d(v), to2d(y), to2d(a)

    n_blocks = rows_padded // block_rows
    tile = pl.BlockSpec((block_rows, _LANES), lambda i: (i, 0))

    out2 = pl.pallas_call(
        _v_update_kernel,
        out_shape=jax.ShapeDtypeStruct((rows_padded, _LANES), dtype),
        grid=(n_blocks,),
        in_specs=[
            pl.BlockSpec(memory_space=pltpu.MemorySpace.SMEM),   # rho2 scalar
            tile, tile, tile,
        ],
        out_specs=tile,
        compiler_params=pltpu.CompilerParams(
            dimension_semantics=("parallel",)),
    )(rho2_arr, v2, y2, a2)

    return out2.reshape((-1,))[:total].reshape(orig_shape)


if __name__ == "__main__":
    key = jax.random.PRNGKey(0)
    kv, ky, ka = jax.random.split(key, 3)

    # Small shapes consistent with the module: batch=2, channels=4, spatial=16.
    shape = (2, 4, 16, 16)
    v_tilde = jax.random.normal(kv, shape, jnp.float32)
    # y models Poisson-distributed observations (non-negative counts).
    y = jax.random.uniform(ky, shape, jnp.float32, minval=0.0, maxval=4.0)
    alpha = 0.1 * jax.random.normal(ka, shape, jnp.float32)
    rho2 = jnp.float32(0.7)

    out = v_update_poisson(v_tilde, y, rho2, alpha)
    out = jax.block_until_ready(out)

    # Pure-JAX reference (mirrors the PyTorch forward exactly).
    t1 = rho2 * v_tilde - alpha
    ref = 0.5 * (1.0 / rho2) * (-t1 + jnp.sqrt(t1 * t1 + 4.0 * y * rho2))

    assert out.shape == shape, out.shape
    assert out.dtype == jnp.float32, out.dtype
    assert bool(jnp.all(jnp.isfinite(out)))
    assert bool(jnp.allclose(out, ref, rtol=1e-5, atol=1e-5))
    print("KERNEL_OK")
</pallas_src>

<mosaic_0001>
module attributes {stable_mosaic.version = 11 : i64} {
  func.func @_v_update_kernel(%arg0: i32, %arg1: memref<1xf32, #tpu.memory_space<smem>>, %arg2: memref<16x128xf32, #tpu.memory_space<vmem>>, %arg3: memref<16x128xf32, #tpu.memory_space<vmem>>, %arg4: memref<16x128xf32, #tpu.memory_space<vmem>>, %arg5: memref<16x128xf32, #tpu.memory_space<vmem>>) attributes {dimension_semantics = [#tpu.dimension_semantics<parallel>], iteration_bounds = array<i64: 1>, scalar_prefetch = 0 : i64, scratch_operands = 0 : i64, tpu.core_type = #tpu.core_type<tc>, window_params = [{transform_indices = @transform_0, window_bounds = array<i64: 1>}, {transform_indices = @transform_1, window_bounds = array<i64: 16, 128>}, {transform_indices = @transform_2, window_bounds = array<i64: 16, 128>}, {transform_indices = @transform_3, window_bounds = array<i64: 16, 128>}, {transform_indices = @transform_4, window_bounds = array<i64: 16, 128>}]} {
    %c0 = arith.constant 0 : index
    %0 = memref.load %arg1[%c0] : memref<1xf32, #tpu.memory_space<smem>>
    %cst = arith.constant 5.000000e-01 : f32
    %1 = arith.divf %cst, %0 : f32
    %cst_0 = arith.constant 4.000000e+00 : f32
    %2 = arith.mulf %cst_0, %0 : f32
    %c0_1 = arith.constant 0 : index
    %c0_2 = arith.constant 0 : index
    %3 = vector.load %arg2[%c0_1, %c0_2] : memref<16x128xf32, #tpu.memory_space<vmem>>, vector<16x128xf32>
    %c0_3 = arith.constant 0 : index
    %c0_4 = arith.constant 0 : index
    %4 = vector.load %arg3[%c0_3, %c0_4] : memref<16x128xf32, #tpu.memory_space<vmem>>, vector<16x128xf32>
    %c0_5 = arith.constant 0 : index
    %c0_6 = arith.constant 0 : index
    %5 = vector.load %arg4[%c0_5, %c0_6] : memref<16x128xf32, #tpu.memory_space<vmem>>, vector<16x128xf32>
    %6 = vector.broadcast %0 : f32 to vector<16x128xf32>
    %7 = arith.mulf %6, %3 : vector<16x128xf32>
    %8 = arith.subf %7, %5 : vector<16x128xf32>
    %9 = arith.mulf %8, %8 : vector<16x128xf32>
    %10 = vector.broadcast %2 : f32 to vector<16x128xf32>
    %11 = arith.mulf %10, %4 : vector<16x128xf32>
    %12 = arith.addf %9, %11 : vector<16x128xf32>
    %13 = math.sqrt %12 : vector<16x128xf32>
    %14 = arith.subf %13, %8 : vector<16x128xf32>
    %15 = vector.broadcast %1 : f32 to vector<16x128xf32>
    %16 = arith.mulf %15, %14 : vector<16x128xf32>
    %c0_7 = arith.constant 0 : index
    %c0_8 = arith.constant 0 : index
    %17 = vector.load %arg5[%c0_7, %c0_8] : memref<16x128xf32, #tpu.memory_space<vmem>>, vector<16x128xf32>
    tpu.vector_store %arg5[%c0_7, %c0_8], %16 {strides = array<i32>} : memref<16x128xf32, #tpu.memory_space<vmem>>, vector<16x128xf32>,
    return
  }
  func.func @transform_0(%arg0: i32) -> i32 {
    %c0_i32 = arith.constant 0 : i32
    %c0_i32_0 = arith.constant 0 : i32
    return %c0_i32 : i32
  }
  func.func @transform_1(%arg0: i32) -> (i32, i32) {
    %c0_i32 = arith.constant 0 : i32
    %c0_i32_0 = arith.constant 0 : i32
    return %arg0, %c0_i32 : i32, i32
  }
  func.func @transform_2(%arg0: i32) -> (i32, i32) {
    %c0_i32 = arith.constant 0 : i32
    %c0_i32_0 = arith.constant 0 : i32
    return %arg0, %c0_i32 : i32, i32
  }
  func.func @transform_3(%arg0: i32) -> (i32, i32) {
    %c0_i32 = arith.constant 0 : i32
    %c0_i32_0 = arith.constant 0 : i32
    return %arg0, %c0_i32 : i32, i32
  }
  func.func @transform_4(%arg0: i32) -> (i32, i32) {
    %c0_i32 = arith.constant 0 : i32
    %c0_i32_0 = arith.constant 0 : i32
    return %arg0, %c0_i32 : i32, i32
  }
}

</mosaic_0001>

<bundles_post_ra>
// kernel: v_update_poisson.1
= control target key start
LH: loop header
LB: loop body
LE: loop exit
PB: predicated region body
PF: predicated region fallthrough
CT: control target
= control target key end

     0   :  { %s130_s0 = inlined_call_operand.<no memory space> [shape: f32[1], index: 0, kind: input, shape index: {}]   ;;  %s131_s1 = inlined_call_operand.vmem [shape: f32[16,128], index: 1, kind: input, shape index: {}]   ;;  %s132_s3 = inlined_call_operand.vmem [shape: f32[16,128], index: 3, kind: input, shape index: {}]   ;;  %s133_s2 = inlined_call_operand.vmem [shape: f32[16,128], index: 2, kind: input, shape index: {}]   ;;  %s134_s4 = inlined_call_operand.vmem [shape: f32[16,128], index: 4, kind: output, shape index: {}]  }
   0x1   :  { %v19_v0 = vstv %s130_s0  ;;  %v24_v2 = vld [vmem:[%s131_s1] sm:$0xff]  ;;  %v25_v3 = vld [vmem:[%s131_s1 + $0x8] sm:$0xff]  ;;  %s23_s23 = smul.f32 4.0, %s130_s0 }
   0x2   :  { %69 = vrcp.f32 %v19_v0  ;;  %v31_v4 = vmul.f32 %v24_v2, %v19_v0  ;;  %v28_v5 = vld [vmem:[%s132_s3] sm:$0xff]  ;;  %v32_v6 = vmul.f32 %v25_v3, %v19_v0  ;;  %v29_v7 = vld [vmem:[%s132_s3 + $0x8] sm:$0xff] }
   0x3   :  { %v26_v9 = vld [vmem:[%s133_s2] sm:$0xff]  ;;  %v37_v10 = vstv %s23_s23  ;;  %v27_v12 = vld [vmem:[%s133_s2 + $0x8] sm:$0xff] }
   0x4   :  { %v33_v8 = vsub.f32 %v31_v4, %v28_v5  ;;  %v34_v11 = vsub.f32 %v32_v6, %v29_v7  ;;  %v38_v13 = vmul.f32 %v37_v10, %v26_v9  ;;  %v39_v15 = vmul.f32 %v37_v10, %v27_v12 }
   0x6   :  { %v35_v14 = vmul.f32 %v33_v8, %v33_v8  ;;  %v36_v16 = vmul.f32 %v34_v11, %v34_v11 }
   0x8   :  { %v40_v17 = vadd.f32 %v38_v13, %v35_v14  ;;  %v41_v18 = vadd.f32 %v39_v15, %v36_v16 }
   0xa   :  { %71 = vrsqrt.f32 %v40_v17  ;;  %vm44_vm0 = vcmp.eq.f32.partialorder %v40_v17, inf  ;;  %vm51_vm1 = vcmp.eq.f32.partialorder %v41_v18, inf  ;;  %v47_v23 = vand.u32 2147483648, %v40_v17 }
   0xb   :  { %73 = vrsqrt.f32 %v41_v18  ;;  %v54_v24 = vand.u32 2147483648, %v41_v18  ;;  %vm46_vm2 = vcmp.eq.f32.partialorder %v40_v17, 0.0  ;;  %vm53_vm3 = vcmp.eq.f32.partialorder %v41_v18, 0.0 }
   0xf   :  { %v70_v1 = vpop.eup %69 }
  0x10   :  { %67 = vpush %v70_v1 }
  0x17   :  { %v72_v19 = vpop.eup %71 }
  0x18   :  { %v74_v20 = vpop.eup %73  ;;  %v43_v21 = vmul.f32 %v72_v19, %v40_v17 }
  0x19   :  { %v50_v22 = vmul.f32 %v74_v20, %v41_v18 }
  0x1a   :  { %v45_v25 = vsel %vm44_vm0, %v40_v17, %v43_v21 }
  0x1b   :  { %v52_v26 = vsel %vm51_vm1, %v41_v18, %v50_v22  ;;  %v48_v27 = vsel %vm46_vm2, %v47_v23, %v45_v25 }
  0x1c   :  { %v55_v28 = vsel %vm53_vm3, %v54_v24, %v52_v26  ;;  %v56_v29 = vsub.f32 %v48_v27, %v33_v8 }
  0x1d   :  { %v57_v30 = vsub.f32 %v55_v28, %v34_v11 }
  0x41   :  { %s68_s0 = spop %67 }
  0x42   :  { %s22_s2 = smul.f32 0.5, %s68_s0 }
  0x44   :  { %v58_v31 = vstv %s22_s2 }
  0x45   :  { %v59_v32 = vmul.f32 %v58_v31, %v56_v29  ;;  %v60_v33 = vmul.f32 %v58_v31, %v57_v30 }
  0x47   :  { %61 = vst [vmem:[%s134_s4] sm:$0xff] %v59_v32  ;;  %62 = vst [vmem:[%s134_s4 + $0x8] sm:$0xff] %v60_v33 }

</bundles_post_ra>
